<compile_context>
chip_gen: v7x
topology: tpu7x:2x2x1
jax: 0.10.0
libtpu: 0.0.40
codegen_flags: <defaults>
</compile_context>

<pallas_src>
import functools

import jax
import jax.numpy as jnp
from jax.experimental import pallas as pl
from jax.experimental.pallas import tpu as pltpu


def _round_up(x, m):
    return ((x + m - 1) // m) * m


def _choose_tiling(n, preferred_tile):
    """Pick (tile_n, n_pad): tile_n multiple of 128, n_pad multiple of tile_n."""
    n128 = _round_up(max(n, 1), 128)
    tile = min(preferred_tile, n128)
    # v7x has 2 TensorCores: make sure the "parallel" axis has >= 2 grid steps
    # whenever there are >= 2 lane-tiles (256 columns) of work.
    if n128 >= 256 and n128 <= tile:
        tile = _round_up(pl.cdiv(n128, 2), 128)
    n_pad = _round_up(n128, tile)
    return tile, n_pad


def _fused_embed_kernel(feature_specs, chunk_n, idx_ref, table_ref, out_ref):
    """Fused multi-feature embedding lookup, lane-dense transposed output.

    feature_specs: static tuple of (vocab_offset, vocab_size) per feature
    idx_ref:   (F, TILE_N)        int32   raw per-feature indices (lane-major)
    table_ref: (D_pad, V_pad)     float32 block-diagonal transposed tables
    out_ref:   (D_pad, TILE_N)    float32 output tile (lane axis dense, sublanes 8-aligned)
    """
    v_pad = table_ref.shape[1]
    tile_n = out_ref.shape[1]
    table = table_ref[...]                                        # tiny, hoisted once
    row_ids = jax.lax.broadcasted_iota(jnp.int32, (v_pad, chunk_n), 0)  # hoisted constant

    # Large DMA tile, small compute chunks: bounds vreg pressure (one-hot + iota +
    # compare temporaries stay well under the 64-vreg file) while amortizing the
    # per-grid-step overhead with the big TILE_N block.
    for c in range(tile_n // chunk_n):                            # static, small unroll
        cols = pl.ds(c * chunk_n, chunk_n)                        # static offsets
        onehot = None
        for f, (v_off, v_size) in enumerate(feature_specs):
            idx_f = idx_ref[pl.ds(f, 1), cols]                    # (1, chunk)
            # Clamp (PyTorch would error on OOB) and shift into the combined vocab
            # with a baked-in Python constant offset.
            cidx = jnp.clip(idx_f, 0, v_size - 1) + v_off
            hit = row_ids == cidx                                 # bool (V_pad, chunk)
            # Vocab blocks are disjoint -> OR of masks == combined one-hot.
            onehot = hit if onehot is None else (onehot | hit)
        out_ref[:, cols] = jnp.dot(
            table, onehot.astype(table.dtype),
            preferred_element_type=jnp.float32,
        ).astype(out_ref.dtype)


def fused_embedding_lookup(idx_fn, combined_table_t, feature_specs, tile_n, chunk_n):
    """idx_fn: (F, N_pad) int32 raw indices; combined_table_t: (D_pad, V_pad) f32.
    Returns (D_pad, N_pad) f32 (transposed, lane-dense)."""
    f, n_pad = idx_fn.shape
    d_pad, v_pad = combined_table_t.shape
    assert n_pad % tile_n == 0 and tile_n % chunk_n == 0

    kernel = functools.partial(_fused_embed_kernel, feature_specs, chunk_n)
    cost = pl.CostEstimate(
        flops=2 * d_pad * v_pad * n_pad,
        transcendentals=0,
        bytes_accessed=4 * (f * n_pad + d_pad * n_pad + d_pad * v_pad),
    )
    return pl.pallas_call(
        kernel,
        out_shape=jax.ShapeDtypeStruct((d_pad, n_pad), jnp.float32),
        grid=(n_pad // tile_n,),
        in_specs=[
            # Indices: TILE_N on the lane axis -> dense vector loads.
            pl.BlockSpec((f, tile_n), lambda i: (0, i)),
            # Tiny combined table, resident every grid step.
            pl.BlockSpec((d_pad, v_pad), lambda i: (0, 0)),
        ],
        out_specs=pl.BlockSpec((d_pad, tile_n), lambda i: (0, i)),
        compiler_params=pltpu.CompilerParams(
            dimension_semantics=("parallel",),   # shards N tiles across v7x's 2 TCs
        ),
        cost_estimate=cost,
    )(idx_fn, combined_table_t)


class TabularEmbeddingPallas:
    """JAX/Pallas port of TabularEmbedding: per-feature nn.Embedding lookups,
    concatenated along the last dim."""

    def __init__(self, vocab_sizes, embedding_dims, key, tile_n=1024):
        self.vocab_sizes = dict(vocab_sizes)
        self.embedding_dims = dict(embedding_dims)
        self.columns = list(self.vocab_sizes.keys())
        self.output_dim = sum(self.embedding_dims.values())
        self.tile_n = int(tile_n)

        # Deterministic init matching nn.Embedding default: weights ~ N(0, 1).
        keys = jax.random.split(key, len(self.columns))
        self.tables = {
            col: jax.random.normal(
                k, (self.vocab_sizes[col], self.embedding_dims[col]), dtype=jnp.float32)
            for k, col in zip(keys, self.columns)
        }

        d_total = self.output_dim
        v_total = sum(self.vocab_sizes.values())
        d_pad = _round_up(d_total, 8)     # 28 -> 32: unmasked 8-aligned sublane groups
        v_pad = _round_up(v_total, 8)     # 41 -> 48

        combined = jnp.zeros((d_pad, v_pad), jnp.float32)
        specs = []
        d_off = v_off = 0
        for col in self.columns:
            v = self.vocab_sizes[col]
            d = self.embedding_dims[col]
            combined = combined.at[d_off:d_off + d, v_off:v_off + v].set(self.tables[col].T)
            specs.append((v_off, v))
            d_off += d
            v_off += v
        self.combined_table_t = combined                # (D_pad, V_pad)
        self.feature_specs = tuple(specs)               # static (offset, vocab) per feature

        table_t = self.combined_table_t
        feature_specs = self.feature_specs
        tile_pref = self.tile_n

        def _fwd(x):
            batch, seq, nf = x.shape
            assert nf == len(feature_specs)
            n = batch * seq
            tile, n_pad = _choose_tiling(n, tile_pref)
            chunk = 256 if tile % 256 == 0 else 128
            # (F, N) lane-major raw indices; offsets/clamping happen in-kernel.
            idx = x.reshape(n, nf).astype(jnp.int32).T
            # Padded tail columns resolve to combined-vocab row 0; they are dropped below.
            idx = jnp.pad(idx, ((0, 0), (0, n_pad - n)))
            out_t = fused_embedding_lookup(idx, table_t, feature_specs, tile, chunk)
            # Crop D/N padding, transpose, reshape: fused into a single pass under jit.
            out = out_t[:d_total].T[:n]
            return out.reshape(batch, seq, d_total)

        self._forward = jax.jit(_fwd)

    def __call__(self, x):
        # x: (batch, seq, num_features) integer indices.
        return self._forward(x)


if __name__ == "__main__":
    key = jax.random.PRNGKey(0)
    k_params, k_data1, k_data2 = jax.random.split(key, 3)

    vocab_sizes = {"cat_a": 11, "cat_b": 7, "cat_c": 23}
    embedding_dims = {"cat_a": 8, "cat_b": 4, "cat_c": 16}
    module = TabularEmbeddingPallas(vocab_sizes, embedding_dims, k_params)

    def make_x(k, batch, seq):
        cols = []
        ks = jax.random.split(k, len(vocab_sizes))
        for kk, col in zip(ks, vocab_sizes):
            cols.append(jax.random.randint(
                kk, (batch, seq, 1), 0, vocab_sizes[col], dtype=jnp.int32))
        return jnp.concatenate(cols, axis=-1)          # (batch, seq, num_features)

    def reference(x):
        return jnp.concatenate(
            [jnp.take(module.tables[col], x[:, :, i], axis=0)
             for i, col in enumerate(vocab_sizes)],
            axis=-1,
        )

    # Case 1: tiny (single grid step).  Case 2: exercises >=2 grid steps, the
    # 256-column compute chunk and the padded tail.
    for (batch, seq), k in (((2, 8), k_data1), ((4, 96), k_data2)):
        x = make_x(k, batch, seq)
        out = jax.block_until_ready(module(x))
        ref = reference(x)
        assert out.shape == (batch, seq, module.output_dim), out.shape
        assert out.dtype == jnp.float32
        assert jnp.allclose(out, ref, atol=1e-5, rtol=1e-5), "mismatch vs reference gather"

    print("KERNEL_OK")
</pallas_src>

<mosaic_0001>
module attributes {stable_mosaic.version = 11 : i64} {
  func.func @_fused_embed_kernel(%arg0: i32, %arg1: memref<3x128xi32, #tpu.memory_space<vmem>>, %arg2: memref<32x48xf32, #tpu.memory_space<vmem>>, %arg3: memref<32x128xf32, #tpu.memory_space<vmem>>) attributes {dimension_semantics = [#tpu.dimension_semantics<parallel>], iteration_bounds = array<i64: 1>, scalar_prefetch = 0 : i64, scratch_operands = 0 : i64, tpu.core_type = #tpu.core_type<tc>, window_params = [{transform_indices = @transform_0, window_bounds = array<i64: 3, 128>}, {pipeline_mode = #tpu.pipeline_mode<synchronous>, transform_indices = @transform_1, window_bounds = array<i64: 32, 48>}, {transform_indices = @transform_2, window_bounds = array<i64: 32, 128>}]} {
    %c0 = arith.constant 0 : index
    %c0_0 = arith.constant 0 : index
    %0 = vector.load %arg2[%c0, %c0_0] : memref<32x48xf32, #tpu.memory_space<vmem>>, vector<32x48xf32>
    %1 = tpu.iota {dimensions = array<i32: 0>} : vector<48x128xi32>
    %c0_1 = arith.constant 0 : index
    %c0_2 = arith.constant 0 : index
    %2 = vector.load %arg1[%c0_1, %c0_2] : memref<3x128xi32, #tpu.memory_space<vmem>>, vector<1x128xi32>
    %c0_i32 = arith.constant 0 : i32
    %c10_i32 = arith.constant 10 : i32
    %3 = vector.broadcast %c0_i32 : i32 to vector<1x128xi32>
    %4 = arith.maxsi %3, %2 : vector<1x128xi32>
    %5 = vector.broadcast %c10_i32 : i32 to vector<1x128xi32>
    %6 = arith.minsi %5, %4 : vector<1x128xi32>
    %c0_i32_3 = arith.constant 0 : i32
    %7 = vector.broadcast %c0_i32_3 : i32 to vector<1x128xi32>
    %8 = arith.addi %6, %7 : vector<1x128xi32>
    %9 = vector.broadcast %8 : vector<1x128xi32> to vector<48x128xi32>
    %10 = arith.cmpi eq, %1, %9 : vector<48x128xi32>
    %c1 = arith.constant 1 : index
    %c0_4 = arith.constant 0 : index
    %11 = vector.load %arg1[%c1, %c0_4] : memref<3x128xi32, #tpu.memory_space<vmem>>, vector<1x128xi32>
    %c0_i32_5 = arith.constant 0 : i32
    %c6_i32 = arith.constant 6 : i32
    %12 = vector.broadcast %c0_i32_5 : i32 to vector<1x128xi32>
    %13 = arith.maxsi %12, %11 : vector<1x128xi32>
    %14 = vector.broadcast %c6_i32 : i32 to vector<1x128xi32>
    %15 = arith.minsi %14, %13 : vector<1x128xi32>
    %c11_i32 = arith.constant 11 : i32
    %16 = vector.broadcast %c11_i32 : i32 to vector<1x128xi32>
    %17 = arith.addi %15, %16 : vector<1x128xi32>
    %18 = vector.broadcast %17 : vector<1x128xi32> to vector<48x128xi32>
    %19 = arith.cmpi eq, %1, %18 : vector<48x128xi32>
    %20 = arith.ori %10, %19 : vector<48x128xi1>
    %c2 = arith.constant 2 : index
    %c0_6 = arith.constant 0 : index
    %21 = vector.load %arg1[%c2, %c0_6] : memref<3x128xi32, #tpu.memory_space<vmem>>, vector<1x128xi32>
    %c0_i32_7 = arith.constant 0 : i32
    %c22_i32 = arith.constant 22 : i32
    %22 = vector.broadcast %c0_i32_7 : i32 to vector<1x128xi32>
    %23 = arith.maxsi %22, %21 : vector<1x128xi32>
    %24 = vector.broadcast %c22_i32 : i32 to vector<1x128xi32>
    %25 = arith.minsi %24, %23 : vector<1x128xi32>
    %c18_i32 = arith.constant 18 : i32
    %26 = vector.broadcast %c18_i32 : i32 to vector<1x128xi32>
    %27 = arith.addi %25, %26 : vector<1x128xi32>
    %28 = vector.broadcast %27 : vector<1x128xi32> to vector<48x128xi32>
    %29 = arith.cmpi eq, %1, %28 : vector<48x128xi32>
    %30 = arith.ori %20, %29 : vector<48x128xi1>
    %31 = arith.extui %30 : vector<48x128xi1> to vector<48x128xi32>
    %32 = arith.sitofp %31 : vector<48x128xi32> to vector<48x128xf32>
    %cst = arith.constant dense<0.000000e+00> : vector<32x128xf32>
    %33 = tpu.matmul %0, %32, %cst {dimension_numbers = #tpu.dot_dimension_numbers<[1], [0], [0], [1], [0, 0, 1, 1], [], []>} : vector<32x48xf32>, vector<48x128xf32>, vector<32x128xf32> -> vector<32x128xf32>
    %c0_8 = arith.constant 0 : index
    %c0_9 = arith.constant 0 : index
    %34 = vector.load %arg3[%c0_8, %c0_9] : memref<32x128xf32, #tpu.memory_space<vmem>>, vector<32x128xf32>
    tpu.vector_store %arg3[%c0_8, %c0_9], %33 {strides = array<i32>} : memref<32x128xf32, #tpu.memory_space<vmem>>, vector<32x128xf32>,
    return
  }
  func.func @transform_0(%arg0: i32) -> (i32, i32) {
    %c0_i32 = arith.constant 0 : i32
    %c0_i32_0 = arith.constant 0 : i32
    return %c0_i32, %arg0 : i32, i32
  }
  func.func @transform_1(%arg0: i32) -> (i32, i32) {
    %c0_i32 = arith.constant 0 : i32
    %c0_i32_0 = arith.constant 0 : i32
    %c0_i32_1 = arith.constant 0 : i32
    return %c0_i32, %c0_i32_0 : i32, i32
  }
  func.func @transform_2(%arg0: i32) -> (i32, i32) {
    %c0_i32 = arith.constant 0 : i32
    %c0_i32_0 = arith.constant 0 : i32
    return %c0_i32, %arg0 : i32, i32
  }
}

</mosaic_0001>

<bundles_post_ra>
// kernel: _fwd.1
= control target key start
LH: loop header
LB: loop body
LE: loop exit
PB: predicated region body
PF: predicated region fallthrough
CT: control target
= control target key end

     0   :  { %7 = vsyncpa [#allocation3], 0  ;;  %s304_s9 = smov [#allocation2]   ;;  %s360_s0 = inlined_call_operand.vmem [shape: s32[3,128], index: 0, kind: input, shape index: {}]   ;;  %s361_s1 = inlined_call_operand.hbm [shape: f32[32,48], index: 1, kind: input, shape index: {}]   ;;  %s362_s2 = inlined_call_operand.vmem [shape: f32[32,128], index: 2, kind: output, shape index: {}]  }
   0x1   :  { %s15_s10 = sshll.u32 %s304_s9, 4  ;;  %s280_s13 = scalar_lea.hbm %s361_s1, 512  ;;  %s16_s10 = int_to_ptr.vmem [resolvable:$true] %s15_s10 }
   0x2   :  { %p281_p0 = scmp.ne.s32.totalorder %s361_s1, %s280_s13  ;;  %p284_p1 = scmp.lt.u32.totalorder %s280_s13, %s361_s1 }
   0x4   :  { %p286_p2 = pnand %p284_p1, %p281_p0 }
   0x6   :  { %289 = shalt.err (!%p286_p2)
}
   0x7   :  { %s290_s18 = scalar_lea.vmem %s16_s10, 512  ;;  %p295_p4 = scmp.lt.s32.totalorder %s16_s10, %s16_s10 }
   0x8   :  { %p291_p3 = scmp.ne.s32.totalorder %s16_s10, %s290_s18  ;;  %p296_p5 = scmp.lt.s32.totalorder %s290_s18, %s290_s18 }
   0xa   :  { %p297_p6 = por %p296_p5, %p295_p4 }
   0xc   :  { %p298_p7 = pnand %p297_p6, %p291_p3 }
   0xe   :  { %301 = shalt.err (!%p298_p7)
}
   0xf   :  { %s305_s19 = smov 128   ;;  %s306_s20 = smov 8  }
  0x10   :  { %21 = dma.hbm_to_vmem [thread:$0]  %s361_s1, 512, %s16_s10, [#allocation3], %s305_s19, %s305_s19, %s306_s20  }
  0x11   :  { %302 = dma.done.wait [#allocation3], 512  }
  0x12   :  { %303 = vsyncadd [#allocation3], 4294966784  ;;  %v29_v0 = vlaneseq  ;;  %vm363_vm0 = vcmask 392192   ;;  %v36_v2 = vld [vmem:[%s360_s0] sm:$0x1]  ;;  %v27_v7 = vld [vmem:[#allocation2 + $0x10] sm:$0xff] }
  0x13   :  { %v51_v3 = vld [vmem:[%s360_s0 + $0x1] sm:$0x1]  ;;  %v73_v4 = vld [vmem:[%s360_s0 + $0x2] sm:$0x1]  ;;  %vm37_vm1 = vcmp.gt.s32.totalorder %v36_v2, 0  ;;  %255 = vmatprep.mubr.msk.f32.mxu1 %vm363_vm0, %v27_v7  ;;  %v26_v25 = vld [vmem:[#allocation2 + $0x8] sm:$0xff] }
  0x14   :  { %v30_v1 = vshrl.u32 %v29_v0, 7  ;;  %vm52_vm2 = vcmp.gt.s32.totalorder %v51_v3, 0  ;;  %vm74_vm3 = vcmp.gt.s32.totalorder %v73_v4, 0  ;;  %v25_v6 = vld [vmem:[#allocation2] sm:$0xff]  ;;  %v38_v8 = vsel %vm37_vm1, %v36_v2, 0  ;;  %v28_v26 = vld [vmem:[#allocation2 + $0x18] sm:$0xff] }
  0x15   :  { %v53_v9 = vsel %vm52_vm2, %v51_v3, 0  ;;  %v75_v10 = vsel %vm74_vm3, %v73_v4, 0  ;;  %252 = vmatprep.mubr.msk.f32.mxu0 %vm363_vm0, %v25_v6  ;;  %vm39_vm4 = vcmp.lt.s32.totalorder %v38_v8, 10  ;;  %v307_v24 = vmov 1.0|1.0  }
  0x16   :  { %v43_v5 = vsub.s32 0, %v30_v1  ;;  %vm54_vm5 = vcmp.lt.s32.totalorder %v53_v9, 6  ;;  %vm76_vm6 = vcmp.lt.s32.totalorder %v75_v10, 22  ;;  %v31_v11 = vadd.s32 8, %v30_v1 }
  0x17   :  { %v40_v12 = vsel %vm39_vm4, %v38_v8, 10  ;;  %v55_v13 = vsel %vm54_vm5, %v53_v9, 6  ;;  %v77_v14 = vsel %vm76_vm6, %v75_v10, 22  ;;  %v32_v20 = vadd.s32 16, %v30_v1 }
  0x18   :  { %v44_v15 = vrot.slane %v40_v12, %v43_v5  ;;  %v56_v16 = vadd.s32 11, %v55_v13  ;;  %v78_v17 = vadd.s32 18, %v77_v14  ;;  %v33_v21 = vadd.s32 24, %v30_v1 }
  0x19   :  { %v34_v22 = vadd.s32 32, %v30_v1  ;;  %v35_v23 = vadd.s32 40, %v30_v1 }
  0x1a   :  { %vm45_vm7 = vcmp.eq.s32.totalorder %v30_v1, %v44_v15  ;;  %v60_v18 = vrot.slane %v56_v16, %v43_v5  ;;  %v82_v19 = vrot.slane %v78_v17, %v43_v5  ;;  %vm46_vm8 = vcmp.eq.s32.totalorder %v31_v11, %v44_v15 }
  0x1b   :  { %vm47_vm1 = vcmp.eq.s32.totalorder %v32_v20, %v44_v15  ;;  %vm48_vm4 = vcmp.eq.s32.totalorder %v33_v21, %v44_v15 }
  0x1c   :  { %vm61_vm9 = vcmp.eq.s32.totalorder %v30_v1, %v60_v18  ;;  %vm62_vm10 = vcmp.eq.s32.totalorder %v31_v11, %v60_v18  ;;  %vm83_vm11 = vcmp.eq.s32.totalorder %v30_v1, %v82_v19  ;;  %vm84_vm13 = vcmp.eq.s32.totalorder %v31_v11, %v82_v19 }
  0x1d   :  { %vm67_vm12 = vmor %vm45_vm7, %vm61_vm9  ;;  %vm63_vm2 = vcmp.eq.s32.totalorder %v32_v20, %v60_v18  ;;  %vm64_vm5 = vcmp.eq.s32.totalorder %v33_v21, %v60_v18  ;;  %vm85_vm0 = vcmp.eq.s32.totalorder %v32_v20, %v82_v19  ;;  %vm86_vm9 = vcmp.eq.s32.totalorder %v33_v21, %v82_v19 }
  0x1e   :  { %vm68_vm14 = vmor %vm46_vm8, %vm62_vm10 }
  0x1f   :  { %vm89_vm15 = vmor %vm67_vm12, %vm83_vm11  ;;  %vm49_vm11 = vcmp.eq.s32.totalorder %v34_v22, %v44_v15  ;;  %vm65_vm12 = vcmp.eq.s32.totalorder %v34_v22, %v60_v18 }
  0x20   :  { %vm90_vm3 = vmor %vm68_vm14, %vm84_vm13  ;;  %vm50_vm14 = vcmp.eq.s32.totalorder %v35_v23, %v44_v15 }
  0x21   :  { %vm258_vm6 = vmpackc.low %vm90_vm3, %vm89_vm15  ;;  %vm66_vm3 = vcmp.eq.s32.totalorder %v35_v23, %v60_v18 }
  0x22   :  { %259 = vmatprep.subr.msk.bf16.mxu0 %vm258_vm6, %v307_v24  ;;  %270 = vmatprep.subr.msk.bf16.mxu1 %vm258_vm6, %v307_v24  ;;  %vm69_vm7 = vmor %vm47_vm1, %vm63_vm2  ;;  %vm87_vm1 = vcmp.eq.s32.totalorder %v34_v22, %v82_v19 }
  0x23   :  { %261 = vmatpush3.bf16.msk.msra.mxu0 %vm258_vm6, %v307_v24  ;;  %273 = vmatpush3.bf16.msk.msra.mxu1 %vm258_vm6, %v307_v24  ;;  %vm70_vm8 = vmor %vm48_vm4, %vm64_vm5  ;;  %vm88_vm6 = vcmp.eq.s32.totalorder %v35_v23, %v82_v19 }
  0x24   :  { %vm91_vm10 = vmor %vm69_vm7, %vm85_vm0 }
  0x25   :  { %vm92_vm13 = vmor %vm70_vm8, %vm86_vm9  ;;  %vm364_vm9 = vcmask 392192  }
  0x26   :  { %vm262_vm15 = vmpackc.low %vm92_vm13, %vm91_vm10 }
  0x27   :  { %263 = vmatprep.subr.msk.bf16.mxu0 %vm262_vm15, %v307_v24  ;;  %271 = vmatprep.subr.msk.bf16.mxu1 %vm262_vm15, %v307_v24  ;;  %vm71_vm2 = vmor %vm49_vm11, %vm65_vm12 }
  0x28   :  { %265 = vmatpush3.bf16.msk.msra.mxu0 %vm262_vm15, %v307_v24  ;;  %274 = vmatpush3.bf16.msk.msra.mxu1 %vm262_vm15, %v307_v24  ;;  %vm72_vm4 = vmor %vm50_vm14, %vm66_vm3 }
  0x29   :  { %vm93_vm5 = vmor %vm71_vm2, %vm87_vm1 }
  0x2a   :  { %vm94_vm0 = vmor %vm72_vm4, %vm88_vm6 }
  0x2b   :  { %vm266_vm7 = vmpackc.low %vm94_vm0, %vm93_vm5 }
  0x2c   :  { %267 = vmatprep.subr.msk.bf16.mxu0 %vm266_vm7, %v307_v24  ;;  %272 = vmatprep.subr.msk.bf16.mxu1 %vm266_vm7, %v307_v24  ;;  %vm365_vm8 = vmmov %vm364_vm9 }
  0x2d   :  { %269 = vmatpush3.bf16.msk.msra.mxu0 %vm266_vm7, %v307_v24  ;;  %275 = vmatpush3.bf16.msk.msra.mxu1 %vm266_vm7, %v307_v24 }
  0x30   :  { %253 = vmatmul.mubr.msk.f32.vlgmr.msra.gmra.mrb[0].mxu0 %vm364_vm9, %v26_v25  ;;  %256 = vmatmul.mubr.msk.f32.vlgmr.msra.gmra.mrb[0].mxu1 %vm365_vm8, %v28_v26 }
 0x103   :  { %v254_v27 = vpop.f32.mrb[0].mxu0  ;;  %v257_v28 = vpop.f32.mrb[0].mxu1 }
 0x104   :  { %206 = vst [vmem:[%s362_s2 + $0x8] sm:$0xff] %v254_v27  ;;  %208 = vst [vmem:[%s362_s2 + $0x18] sm:$0xff] %v257_v28  ;;  %v186_v29 = vpop.f32.mrb[1].mxu0  ;;  %v196_v30 = vpop.f32.mrb[1].mxu1 }
 0x105   :  { %205 = vst [vmem:[%s362_s2] sm:$0xff] %v186_v29  ;;  %207 = vst [vmem:[%s362_s2 + $0x10] sm:$0xff] %v196_v30 }
 0x106   :  { %213 = vsyncpa [#allocation3], 1 }

</bundles_post_ra>
